<compile_context>
chip_gen: v6e
topology: v6e:2x2x1
jax: 0.10.0
libtpu: 0.0.40
codegen_flags: <defaults>
</compile_context>

<pallas_src>
import functools

import jax
import jax.numpy as jnp
from jax.experimental import pallas as pl
from jax.experimental.pallas import tpu as pltpu


# ---------------------------------------------------------------------------
# get_neuron_config — verbatim port of the reference helper
# ---------------------------------------------------------------------------
def get_neuron_config(nl):
    n = len(nl)
    assert n > 1, 'The neuron config should have at least 2 layers.'
    if n % 2 == 0:
        d_out = nl[-1]
        nl = nl[:-1]
    config = []
    for i in range(1, len(nl) - 1, 2):
        config.append({'in_features': nl[i - 1],
                       'hidden_features': nl[i],
                       'out_features': nl[i + 1]})
    if n % 2 == 0:
        config.append({'in_features': nl[-1], 'out_features': d_out})
    return config


def _round_up(x, m):
    return ((x + m - 1) // m) * m


def _row_tiling(n, tm_max):
    """Row tile size + padded row count.  Prefers >=2 grid steps (v7x megacore)."""
    n8 = _round_up(max(n, 1), 8)
    tm = min(tm_max, n8)
    if tm == n8 and n8 >= 16:          # split so both TensorCores get work on v7x
        tm = _round_up(n8 // 2, 8)
    n_pad = _round_up(n8, tm)
    return tm, n_pad


# Explicit VMEM limit: v5e's scoped default is 16 MiB; tiles here use only a
# few MiB even at tm=2048, but make headroom explicit and portable.
_MOSAIC_PARAMS = pltpu.CompilerParams(
    dimension_semantics=("parallel",),
    vmem_limit_bytes=32 * 1024 * 1024,
)


# ---------------------------------------------------------------------------
# Pallas kernels
# ---------------------------------------------------------------------------
def _node_kernel(sp_ref, w_ne_ref, b_ne_ref,
                 w1_ref, b1_ref, w2_ref, b2_ref, w3_ref, b3_ref, o_ref):
    # Fused node path:
    #   x = one_hot(species) @ W_ne + b_ne     (gather via where-select chain; the
    #                                            species table is tiny and resident)
    #   y = (tanh(x @ W1 + b1) @ W2 + b2) + x
    #   o = y @ W3 + b3
    sp = sp_ref[...]                                         # (tm, 1) int32
    w_ne = w_ne_ref[...]                                     # (n_species, d_node)
    n_species = w_ne.shape[0]
    emb = jnp.zeros((sp.shape[0], w_ne.shape[1]), jnp.float32)
    for s in range(n_species):                               # tiny static unroll
        row = w_ne[s:s + 1, :].astype(jnp.float32)           # (1, d_node)
        emb = jnp.where(sp == s, row, emb)
    x = emb + b_ne_ref[...]                                  # f32 node embedding

    h = jnp.tanh(jnp.dot(x.astype(w1_ref.dtype), w1_ref[...],
                         preferred_element_type=jnp.float32) + b1_ref[...])
    y = (jnp.dot(h.astype(w2_ref.dtype), w2_ref[...],
                 preferred_element_type=jnp.float32) + b2_ref[...] + x)
    o_ref[...] = (jnp.dot(y.astype(w3_ref.dtype), w3_ref[...],
                          preferred_element_type=jnp.float32)
                  + b3_ref[...]).astype(o_ref.dtype)


def _edge_kernel(d_ref, centers_ref, we_ref, be_ref,
                 w1_ref, b1_ref, w2_ref, b2_ref, w3_ref, b3_ref, o_ref):
    # Fused edge path:
    #   rbf = exp(-4 * (d - centers)^2)        (EUP; streamed input is 4 B/row)
    #   e   = rbf @ We + be
    #   y   = (tanh(e @ W1 + b1) @ W2 + b2) + e
    #   o   = y @ W3 + b3
    d = d_ref[...]                                           # (tm, 1) f32
    rbf = jnp.exp(-4.0 * (d - centers_ref[...]) ** 2)        # (tm, n_rbf) f32
    e = (jnp.dot(rbf.astype(we_ref.dtype), we_ref[...],
                 preferred_element_type=jnp.float32) + be_ref[...])
    h = jnp.tanh(jnp.dot(e.astype(w1_ref.dtype), w1_ref[...],
                         preferred_element_type=jnp.float32) + b1_ref[...])
    y = (jnp.dot(h.astype(w2_ref.dtype), w2_ref[...],
                 preferred_element_type=jnp.float32) + b2_ref[...] + e)
    o_ref[...] = (jnp.dot(y.astype(w3_ref.dtype), w3_ref[...],
                          preferred_element_type=jnp.float32)
                  + b3_ref[...]).astype(o_ref.dtype)


# ---------------------------------------------------------------------------
# Wrappers
# ---------------------------------------------------------------------------
def pallas_node_path(species, embed_params, head_params, *, tm_max=2048):
    """Fused node-embedding gather + ResBlock + final Linear over row tiles."""
    w_ne, b_ne = embed_params
    w1, b1, w2, b2, w3, b3 = head_params
    n = species.shape[0]
    n_species, d_node = w_ne.shape
    d_hidden = w1.shape[1]
    d_out = w3.shape[1]
    assert w1.shape[0] == d_node and w2.shape == (d_hidden, d_node), \
        "ResBlock residual requires in_features == out_features"

    tm, n_pad = _row_tiling(n, tm_max)
    sp = jnp.pad(species.astype(jnp.int32).reshape(n, 1), ((0, n_pad - n), (0, 0)))

    flops = 2 * n_pad * (d_node * d_hidden + d_hidden * d_node + d_node * d_out)
    bytes_accessed = (sp.size * 4 + n_pad * d_out * 4
                      + sum(int(a.size) * a.dtype.itemsize
                            for a in (w_ne, b_ne, w1, b1, w2, b2, w3, b3)))

    out = pl.pallas_call(
        _node_kernel,
        out_shape=jax.ShapeDtypeStruct((n_pad, d_out), jnp.float32),
        grid=(n_pad // tm,),
        in_specs=[
            # Streamed rows.  (If DMA is ever exposed at large tm, add
            # pipeline_mode=pl.Buffered(3) here.)
            pl.BlockSpec((tm, 1), lambda i: (i, 0)),
            # Weights/biases: constant index_map -> resident in VMEM across steps.
            pl.BlockSpec((n_species, d_node), lambda i: (0, 0)),
            pl.BlockSpec((1, d_node), lambda i: (0, 0)),
            pl.BlockSpec((d_node, d_hidden), lambda i: (0, 0)),
            pl.BlockSpec((1, d_hidden), lambda i: (0, 0)),
            pl.BlockSpec((d_hidden, d_node), lambda i: (0, 0)),
            pl.BlockSpec((1, d_node), lambda i: (0, 0)),
            pl.BlockSpec((d_node, d_out), lambda i: (0, 0)),
            pl.BlockSpec((1, d_out), lambda i: (0, 0)),
        ],
        out_specs=pl.BlockSpec((tm, d_out), lambda i: (i, 0)),
        compiler_params=_MOSAIC_PARAMS,
        cost_estimate=pl.CostEstimate(flops=flops,
                                      transcendentals=n_pad * d_hidden,
                                      bytes_accessed=bytes_accessed),
    )(sp, w_ne, b_ne, w1, b1, w2, b2, w3, b3)
    return out[:n]


def pallas_edge_path(d, centers, embed_params, head_params, *, tm_max=2048):
    """Fused RBF featurization + embedding Linear + ResBlock + final Linear."""
    we, be = embed_params
    w1, b1, w2, b2, w3, b3 = head_params
    n = d.shape[0]
    n_rbf, d_emb = we.shape
    d_hidden = w1.shape[1]
    d_out = w3.shape[1]
    assert centers.shape == (1, n_rbf)
    assert w1.shape[0] == d_emb and w2.shape == (d_hidden, d_emb), \
        "ResBlock residual requires in_features == out_features"

    tm, n_pad = _row_tiling(n, tm_max)
    d_p = jnp.pad(d.astype(jnp.float32).reshape(n, 1), ((0, n_pad - n), (0, 0)))

    flops = 2 * n_pad * (n_rbf * d_emb + d_emb * d_hidden
                         + d_hidden * d_emb + d_emb * d_out)
    bytes_accessed = (d_p.size * 4 + n_pad * d_out * 4
                      + sum(int(a.size) * a.dtype.itemsize
                            for a in (centers, we, be, w1, b1, w2, b2, w3, b3)))

    out = pl.pallas_call(
        _edge_kernel,
        out_shape=jax.ShapeDtypeStruct((n_pad, d_out), jnp.float32),
        grid=(n_pad // tm,),
        in_specs=[
            pl.BlockSpec((tm, 1), lambda i: (i, 0)),          # streamed distances
            pl.BlockSpec((1, n_rbf), lambda i: (0, 0)),        # RBF centers
            pl.BlockSpec((n_rbf, d_emb), lambda i: (0, 0)),
            pl.BlockSpec((1, d_emb), lambda i: (0, 0)),
            pl.BlockSpec((d_emb, d_hidden), lambda i: (0, 0)),
            pl.BlockSpec((1, d_hidden), lambda i: (0, 0)),
            pl.BlockSpec((d_hidden, d_emb), lambda i: (0, 0)),
            pl.BlockSpec((1, d_emb), lambda i: (0, 0)),
            pl.BlockSpec((d_emb, d_out), lambda i: (0, 0)),
            pl.BlockSpec((1, d_out), lambda i: (0, 0)),
        ],
        out_specs=pl.BlockSpec((tm, d_out), lambda i: (i, 0)),
        compiler_params=_MOSAIC_PARAMS,
        cost_estimate=pl.CostEstimate(flops=flops,
                                      transcendentals=n_pad * (n_rbf + d_hidden),
                                      bytes_accessed=bytes_accessed),
    )(d_p, centers, we, be, w1, b1, w2, b2, w3, b3)
    return out[:n]


# ---------------------------------------------------------------------------
# Deterministic parameter construction (synthetic, no checkpoint load)
# ---------------------------------------------------------------------------
def _init_linear(key, d_in, d_out, w_dtype=jnp.float32):
    kw, kb = jax.random.split(key)
    scale = 1.0 / jnp.sqrt(jnp.asarray(d_in, jnp.float32))
    w = jax.random.uniform(kw, (d_in, d_out), jnp.float32, -scale, scale)
    b = jax.random.uniform(kb, (1, d_out), jnp.float32, -scale, scale)
    # Weights are cast ONCE here (not per call); biases stay f32 so all VPU/EUP
    # math in the kernels is f32 (safe on v5e, bounded deviation in bf16 mode).
    return w.astype(w_dtype), b


def build_dptb_params(key, *, n_species, out_node_dim, out_edge_dim,
                      hidden_neurons, n_onsite_Es, reduced_matrix_element,
                      n_rbf, compute_dtype=jnp.float32):
    keys = jax.random.split(key, 8)
    # Embedding
    w_ne, b_ne = _init_linear(keys[0], n_species, out_node_dim, compute_dtype)
    w_ee, b_ee = _init_linear(keys[1], n_rbf, out_edge_dim, compute_dtype)

    # node_prediction_h neurons: [out_node_dim] + hidden + [n_onsite_Es]
    node_cfg = get_neuron_config([out_node_dim] + hidden_neurons + [n_onsite_Es])
    assert len(node_cfg) == 2 and 'hidden_features' in node_cfg[0]
    c0, c1 = node_cfg
    assert c0['in_features'] == c0['out_features'], "residual block needs in == out"
    nw1, nb1 = _init_linear(keys[2], c0['in_features'], c0['hidden_features'], compute_dtype)
    nw2, nb2 = _init_linear(keys[3], c0['hidden_features'], c0['out_features'], compute_dtype)
    nw3, nb3 = _init_linear(keys[4], c1['in_features'], c1['out_features'], compute_dtype)
    node_params = (nw1, nb1, nw2, nb2, nw3, nb3)

    # edge_prediction_h neurons: [out_edge_dim] + hidden + [reduced_matrix_element]
    edge_cfg = get_neuron_config([out_edge_dim] + hidden_neurons + [reduced_matrix_element])
    assert len(edge_cfg) == 2 and 'hidden_features' in edge_cfg[0]
    c0, c1 = edge_cfg
    assert c0['in_features'] == c0['out_features'], "residual block needs in == out"
    ew1, eb1 = _init_linear(keys[5], c0['in_features'], c0['hidden_features'], compute_dtype)
    ew2, eb2 = _init_linear(keys[6], c0['hidden_features'], c0['out_features'], compute_dtype)
    ew3, eb3 = _init_linear(keys[7], c1['in_features'], c1['out_features'], compute_dtype)
    edge_params = (ew1, eb1, ew2, eb2, ew3, eb3)

    return dict(node_embed=(w_ne, b_ne), edge_embed=(w_ee, b_ee),
                node_pred=node_params, edge_pred=edge_params)


# ---------------------------------------------------------------------------
# DPTB forward (sktb method, no overlap)
# ---------------------------------------------------------------------------
def dptb_forward(params, species, positions, edge_index, *, n_rbf):
    # --- edge distances (glue math in JAX; featurization happens in-kernel) ---
    src, dst = edge_index[0], edge_index[1]
    d = jnp.linalg.norm(positions[dst] - positions[src], axis=-1,
                        keepdims=True).astype(jnp.float32)          # [N_edge, 1]
    centers = jnp.linspace(0.5, 5.0, n_rbf, dtype=jnp.float32)[None, :]

    # --- fused Pallas passes: one kernel launch per field ---
    node_feat = pallas_node_path(species, params['node_embed'],
                                 params['node_pred'])               # [N_at, n_onsite_Es]
    edge_feat = pallas_edge_path(d, centers, params['edge_embed'],
                                 params['edge_pred'])               # [N_edge, reduced_matrix_element]

    # TODO(synk): SKHamiltonian transform (Slater-Koster rotation of the
    # irreducible matrix elements into hamiltonian blocks) is not implemented.
    return {'node_features': node_feat, 'edge_features': edge_feat}


# ---------------------------------------------------------------------------
if __name__ == "__main__":
    N_ATOMS = 16
    N_EDGES = 32
    N_SPECIES = 2
    N_RBF = 32
    OUT_NODE_DIM = 32
    OUT_EDGE_DIM = 32
    HIDDEN_NEURONS = [64, 32]          # prediction['neurons']
    N_ONSITE_ES = 8                    # idp.n_onsite_Es
    REDUCED_MAT_ELEM = 16              # idp.reduced_matrix_element
    COMPUTE_DTYPE = jnp.float32        # set jnp.bfloat16 on v6e/v7x for HBM win

    key = jax.random.PRNGKey(0)
    k_param, k_sp, k_pos, k_src, k_dst = jax.random.split(key, 5)

    params = build_dptb_params(
        k_param, n_species=N_SPECIES, out_node_dim=OUT_NODE_DIM,
        out_edge_dim=OUT_EDGE_DIM, hidden_neurons=HIDDEN_NEURONS,
        n_onsite_Es=N_ONSITE_ES, reduced_matrix_element=REDUCED_MAT_ELEM,
        n_rbf=N_RBF, compute_dtype=COMPUTE_DTYPE)

    species = jax.random.randint(k_sp, (N_ATOMS,), 0, N_SPECIES)
    positions = jax.random.uniform(k_pos, (N_ATOMS, 3), jnp.float32, 0.0, 6.0)
    edge_index = jnp.stack([
        jax.random.randint(k_src, (N_EDGES,), 0, N_ATOMS),
        jax.random.randint(k_dst, (N_EDGES,), 0, N_ATOMS),
    ], axis=0)

    fwd = jax.jit(functools.partial(dptb_forward, n_rbf=N_RBF))
    out = fwd(params, species, positions, edge_index)
    jax.block_until_ready(out)

    assert out['node_features'].shape == (N_ATOMS, N_ONSITE_ES)
    assert out['edge_features'].shape == (N_EDGES, REDUCED_MAT_ELEM)
    assert jnp.all(jnp.isfinite(out['node_features']))
    assert jnp.all(jnp.isfinite(out['edge_features']))
    print("KERNEL_OK")
</pallas_src>

<mosaic_0001>
module attributes {stable_mosaic.version = 11 : i64} {
  func.func @_edge_kernel(%arg0: i32, %arg1: memref<16x1xf32, #tpu.memory_space<vmem>>, %arg2: memref<1x32xf32, #tpu.memory_space<vmem>>, %arg3: memref<32x32xf32, #tpu.memory_space<vmem>>, %arg4: memref<1x32xf32, #tpu.memory_space<vmem>>, %arg5: memref<32x64xf32, #tpu.memory_space<vmem>>, %arg6: memref<1x64xf32, #tpu.memory_space<vmem>>, %arg7: memref<64x32xf32, #tpu.memory_space<vmem>>, %arg8: memref<1x32xf32, #tpu.memory_space<vmem>>, %arg9: memref<32x16xf32, #tpu.memory_space<vmem>>, %arg10: memref<1x16xf32, #tpu.memory_space<vmem>>, %arg11: memref<16x16xf32, #tpu.memory_space<vmem>>) attributes {dimension_semantics = [#tpu.dimension_semantics<parallel>], iteration_bounds = array<i64: 2>, scalar_prefetch = 0 : i64, scratch_operands = 0 : i64, tpu.core_type = #tpu.core_type<tc>, window_params = [{transform_indices = @transform_0, window_bounds = array<i64: 16, 1>}, {pipeline_mode = #tpu.pipeline_mode<synchronous>, transform_indices = @transform_1, window_bounds = array<i64: 1, 32>}, {pipeline_mode = #tpu.pipeline_mode<synchronous>, transform_indices = @transform_2, window_bounds = array<i64: 32, 32>}, {pipeline_mode = #tpu.pipeline_mode<synchronous>, transform_indices = @transform_3, window_bounds = array<i64: 1, 32>}, {pipeline_mode = #tpu.pipeline_mode<synchronous>, transform_indices = @transform_4, window_bounds = array<i64: 32, 64>}, {pipeline_mode = #tpu.pipeline_mode<synchronous>, transform_indices = @transform_5, window_bounds = array<i64: 1, 64>}, {pipeline_mode = #tpu.pipeline_mode<synchronous>, transform_indices = @transform_6, window_bounds = array<i64: 64, 32>}, {pipeline_mode = #tpu.pipeline_mode<synchronous>, transform_indices = @transform_7, window_bounds = array<i64: 1, 32>}, {pipeline_mode = #tpu.pipeline_mode<synchronous>, transform_indices = @transform_8, window_bounds = array<i64: 32, 16>}, {pipeline_mode = #tpu.pipeline_mode<synchronous>, transform_indices = @transform_9, window_bounds = array<i64: 1, 16>}, {transform_indices = @transform_10, window_bounds = array<i64: 16, 16>}]} {
    %c0 = arith.constant 0 : index
    %c0_0 = arith.constant 0 : index
    %0 = vector.load %arg1[%c0, %c0_0] : memref<16x1xf32, #tpu.memory_space<vmem>>, vector<16x1xf32>
    %c0_1 = arith.constant 0 : index
    %c0_2 = arith.constant 0 : index
    %1 = vector.load %arg2[%c0_1, %c0_2] : memref<1x32xf32, #tpu.memory_space<vmem>>, vector<1x32xf32>
    %2 = vector.broadcast %0 : vector<16x1xf32> to vector<16x32xf32>
    %3 = vector.broadcast %1 : vector<1x32xf32> to vector<16x32xf32>
    %4 = arith.subf %2, %3 : vector<16x32xf32>
    %5 = arith.mulf %4, %4 : vector<16x32xf32>
    %cst = arith.constant -4.000000e+00 : f32
    %6 = vector.broadcast %cst : f32 to vector<16x32xf32>
    %7 = arith.mulf %6, %5 : vector<16x32xf32>
    %8 = math.exp %7 : vector<16x32xf32>
    %c0_3 = arith.constant 0 : index
    %c0_4 = arith.constant 0 : index
    %9 = vector.load %arg3[%c0_3, %c0_4] : memref<32x32xf32, #tpu.memory_space<vmem>>, vector<32x32xf32>
    %cst_5 = arith.constant dense<0.000000e+00> : vector<16x32xf32>
    %10 = tpu.matmul %8, %9, %cst_5 {dimension_numbers = #tpu.dot_dimension_numbers<[1], [0], [0], [1], [0, 0, 1, 1], [], []>} : vector<16x32xf32>, vector<32x32xf32>, vector<16x32xf32> -> vector<16x32xf32>
    %c0_6 = arith.constant 0 : index
    %c0_7 = arith.constant 0 : index
    %11 = vector.load %arg4[%c0_6, %c0_7] : memref<1x32xf32, #tpu.memory_space<vmem>>, vector<1x32xf32>
    %12 = vector.broadcast %11 : vector<1x32xf32> to vector<16x32xf32>
    %13 = arith.addf %10, %12 : vector<16x32xf32>
    %c0_8 = arith.constant 0 : index
    %c0_9 = arith.constant 0 : index
    %14 = vector.load %arg5[%c0_8, %c0_9] : memref<32x64xf32, #tpu.memory_space<vmem>>, vector<32x64xf32>
    %cst_10 = arith.constant dense<0.000000e+00> : vector<16x64xf32>
    %15 = tpu.matmul %13, %14, %cst_10 {dimension_numbers = #tpu.dot_dimension_numbers<[1], [0], [0], [1], [0, 0, 1, 1], [], []>} : vector<16x32xf32>, vector<32x64xf32>, vector<16x64xf32> -> vector<16x64xf32>
    %c0_11 = arith.constant 0 : index
    %c0_12 = arith.constant 0 : index
    %16 = vector.load %arg6[%c0_11, %c0_12] : memref<1x64xf32, #tpu.memory_space<vmem>>, vector<1x64xf32>
    %17 = vector.broadcast %16 : vector<1x64xf32> to vector<16x64xf32>
    %18 = arith.addf %15, %17 : vector<16x64xf32>
    %19 = math.tanh %18 : vector<16x64xf32>
    %c0_13 = arith.constant 0 : index
    %c0_14 = arith.constant 0 : index
    %20 = vector.load %arg7[%c0_13, %c0_14] : memref<64x32xf32, #tpu.memory_space<vmem>>, vector<64x32xf32>
    %cst_15 = arith.constant dense<0.000000e+00> : vector<16x32xf32>
    %21 = tpu.matmul %19, %20, %cst_15 {dimension_numbers = #tpu.dot_dimension_numbers<[1], [0], [0], [1], [0, 0, 1, 1], [], []>} : vector<16x64xf32>, vector<64x32xf32>, vector<16x32xf32> -> vector<16x32xf32>
    %c0_16 = arith.constant 0 : index
    %c0_17 = arith.constant 0 : index
    %22 = vector.load %arg8[%c0_16, %c0_17] : memref<1x32xf32, #tpu.memory_space<vmem>>, vector<1x32xf32>
    %23 = vector.broadcast %22 : vector<1x32xf32> to vector<16x32xf32>
    %24 = arith.addf %21, %23 : vector<16x32xf32>
    %25 = arith.addf %24, %13 : vector<16x32xf32>
    %c0_18 = arith.constant 0 : index
    %c0_19 = arith.constant 0 : index
    %26 = vector.load %arg9[%c0_18, %c0_19] : memref<32x16xf32, #tpu.memory_space<vmem>>, vector<32x16xf32>
    %cst_20 = arith.constant dense<0.000000e+00> : vector<16x16xf32>
    %27 = tpu.matmul %25, %26, %cst_20 {dimension_numbers = #tpu.dot_dimension_numbers<[1], [0], [0], [1], [0, 0, 1, 1], [], []>} : vector<16x32xf32>, vector<32x16xf32>, vector<16x16xf32> -> vector<16x16xf32>
    %c0_21 = arith.constant 0 : index
    %c0_22 = arith.constant 0 : index
    %28 = vector.load %arg10[%c0_21, %c0_22] : memref<1x16xf32, #tpu.memory_space<vmem>>, vector<1x16xf32>
    %29 = vector.broadcast %28 : vector<1x16xf32> to vector<16x16xf32>
    %30 = arith.addf %27, %29 : vector<16x16xf32>
    %c0_23 = arith.constant 0 : index
    %c0_24 = arith.constant 0 : index
    %31 = vector.load %arg11[%c0_23, %c0_24] : memref<16x16xf32, #tpu.memory_space<vmem>>, vector<16x16xf32>
    tpu.vector_store %arg11[%c0_23, %c0_24], %30 {strides = array<i32>} : memref<16x16xf32, #tpu.memory_space<vmem>>, vector<16x16xf32>,
    return
  }
  func.func @transform_0(%arg0: i32) -> (i32, i32) {
    %c0_i32 = arith.constant 0 : i32
    %c0_i32_0 = arith.constant 0 : i32
    return %arg0, %c0_i32 : i32, i32
  }
  func.func @transform_1(%arg0: i32) -> (i32, i32) {
    %c0_i32 = arith.constant 0 : i32
    %c0_i32_0 = arith.constant 0 : i32
    %c0_i32_1 = arith.constant 0 : i32
    return %c0_i32, %c0_i32_0 : i32, i32
  }
  func.func @transform_2(%arg0: i32) -> (i32, i32) {
    %c0_i32 = arith.constant 0 : i32
    %c0_i32_0 = arith.constant 0 : i32
    %c0_i32_1 = arith.constant 0 : i32
    return %c0_i32, %c0_i32_0 : i32, i32
  }
  func.func @transform_3(%arg0: i32) -> (i32, i32) {
    %c0_i32 = arith.constant 0 : i32
    %c0_i32_0 = arith.constant 0 : i32
    %c0_i32_1 = arith.constant 0 : i32
    return %c0_i32, %c0_i32_0 : i32, i32
  }
  func.func @transform_4(%arg0: i32) -> (i32, i32) {
    %c0_i32 = arith.constant 0 : i32
    %c0_i32_0 = arith.constant 0 : i32
    %c0_i32_1 = arith.constant 0 : i32
    return %c0_i32, %c0_i32_0 : i32, i32
  }
  func.func @transform_5(%arg0: i32) -> (i32, i32) {
    %c0_i32 = arith.constant 0 : i32
    %c0_i32_0 = arith.constant 0 : i32
    %c0_i32_1 = arith.constant 0 : i32
    return %c0_i32, %c0_i32_0 : i32, i32
  }
  func.func @transform_6(%arg0: i32) -> (i32, i32) {
    %c0_i32 = arith.constant 0 : i32
    %c0_i32_0 = arith.constant 0 : i32
    %c0_i32_1 = arith.constant 0 : i32
    return %c0_i32, %c0_i32_0 : i32, i32
  }
  func.func @transform_7(%arg0: i32) -> (i32, i32) {
    %c0_i32 = arith.constant 0 : i32
    %c0_i32_0 = arith.constant 0 : i32
    %c0_i32_1 = arith.constant 0 : i32
    return %c0_i32, %c0_i32_0 : i32, i32
  }
  func.func @transform_8(%arg0: i32) -> (i32, i32) {
    %c0_i32 = arith.constant 0 : i32
    %c0_i32_0 = arith.constant 0 : i32
    %c0_i32_1 = arith.constant 0 : i32
    return %c0_i32, %c0_i32_0 : i32, i32
  }
  func.func @transform_9(%arg0: i32) -> (i32, i32) {
    %c0_i32 = arith.constant 0 : i32
    %c0_i32_0 = arith.constant 0 : i32
    %c0_i32_1 = arith.constant 0 : i32
    return %c0_i32, %c0_i32_0 : i32, i32
  }
  func.func @transform_10(%arg0: i32) -> (i32, i32) {
    %c0_i32 = arith.constant 0 : i32
    %c0_i32_0 = arith.constant 0 : i32
    return %arg0, %c0_i32 : i32, i32
  }
}

module attributes {stable_mosaic.version = 11 : i64} {
  func.func @_node_kernel(%arg0: i32, %arg1: memref<8x1xi32, #tpu.memory_space<vmem>>, %arg2: memref<2x32xf32, #tpu.memory_space<vmem>>, %arg3: memref<1x32xf32, #tpu.memory_space<vmem>>, %arg4: memref<32x64xf32, #tpu.memory_space<vmem>>, %arg5: memref<1x64xf32, #tpu.memory_space<vmem>>, %arg6: memref<64x32xf32, #tpu.memory_space<vmem>>, %arg7: memref<1x32xf32, #tpu.memory_space<vmem>>, %arg8: memref<32x8xf32, #tpu.memory_space<vmem>>, %arg9: memref<1x8xf32, #tpu.memory_space<vmem>>, %arg10: memref<8x8xf32, #tpu.memory_space<vmem>>) attributes {dimension_semantics = [#tpu.dimension_semantics<parallel>], iteration_bounds = array<i64: 2>, scalar_prefetch = 0 : i64, scratch_operands = 0 : i64, tpu.core_type = #tpu.core_type<tc>, window_params = [{transform_indices = @transform_0, window_bounds = array<i64: 8, 1>}, {pipeline_mode = #tpu.pipeline_mode<synchronous>, transform_indices = @transform_1, window_bounds = array<i64: 2, 32>}, {pipeline_mode = #tpu.pipeline_mode<synchronous>, transform_indices = @transform_2, window_bounds = array<i64: 1, 32>}, {pipeline_mode = #tpu.pipeline_mode<synchronous>, transform_indices = @transform_3, window_bounds = array<i64: 32, 64>}, {pipeline_mode = #tpu.pipeline_mode<synchronous>, transform_indices = @transform_4, window_bounds = array<i64: 1, 64>}, {pipeline_mode = #tpu.pipeline_mode<synchronous>, transform_indices = @transform_5, window_bounds = array<i64: 64, 32>}, {pipeline_mode = #tpu.pipeline_mode<synchronous>, transform_indices = @transform_6, window_bounds = array<i64: 1, 32>}, {pipeline_mode = #tpu.pipeline_mode<synchronous>, transform_indices = @transform_7, window_bounds = array<i64: 32, 8>}, {pipeline_mode = #tpu.pipeline_mode<synchronous>, transform_indices = @transform_8, window_bounds = array<i64: 1, 8>}, {transform_indices = @transform_9, window_bounds = array<i64: 8, 8>}]} {
    %c0 = arith.constant 0 : index
    %c0_0 = arith.constant 0 : index
    %0 = vector.load %arg1[%c0, %c0_0] : memref<8x1xi32, #tpu.memory_space<vmem>>, vector<8x1xi32>
    %c0_1 = arith.constant 0 : index
    %c0_2 = arith.constant 0 : index
    %1 = vector.load %arg2[%c0_1, %c0_2] : memref<2x32xf32, #tpu.memory_space<vmem>>, vector<2x32xf32>
    %cst = arith.constant 0.000000e+00 : f32
    %2 = vector.broadcast %cst : f32 to vector<8x32xf32>
    %3 = vector.extract_strided_slice %1 {offsets = [0, 0], sizes = [1, 32], strides = [1, 1]} : vector<2x32xf32> to vector<1x32xf32>
    %c0_i32 = arith.constant 0 : i32
    %4 = vector.broadcast %c0_i32 : i32 to vector<8x1xi32>
    %5 = arith.cmpi eq, %0, %4 : vector<8x1xi32>
    %6 = vector.shape_cast %5 : vector<8x1xi1> to vector<8x1xi1>
    %7 = vector.broadcast %6 : vector<8x1xi1> to vector<8x32xi1>
    %8 = vector.shape_cast %3 : vector<1x32xf32> to vector<1x32xf32>
    %9 = vector.broadcast %8 : vector<1x32xf32> to vector<8x32xf32>
    %10 = arith.select %7, %9, %2 : vector<8x32xi1>, vector<8x32xf32>
    %11 = vector.extract_strided_slice %1 {offsets = [1, 0], sizes = [1, 32], strides = [1, 1]} : vector<2x32xf32> to vector<1x32xf32>
    %c1_i32 = arith.constant 1 : i32
    %12 = vector.broadcast %c1_i32 : i32 to vector<8x1xi32>
    %13 = arith.cmpi eq, %0, %12 : vector<8x1xi32>
    %14 = vector.shape_cast %13 : vector<8x1xi1> to vector<8x1xi1>
    %15 = vector.broadcast %14 : vector<8x1xi1> to vector<8x32xi1>
    %16 = vector.shape_cast %11 : vector<1x32xf32> to vector<1x32xf32>
    %17 = vector.broadcast %16 : vector<1x32xf32> to vector<8x32xf32>
    %18 = arith.select %15, %17, %10 : vector<8x32xi1>, vector<8x32xf32>
    %c0_3 = arith.constant 0 : index
    %c0_4 = arith.constant 0 : index
    %19 = vector.load %arg3[%c0_3, %c0_4] : memref<1x32xf32, #tpu.memory_space<vmem>>, vector<1x32xf32>
    %20 = vector.broadcast %19 : vector<1x32xf32> to vector<8x32xf32>
    %21 = arith.addf %18, %20 : vector<8x32xf32>
    %c0_5 = arith.constant 0 : index
    %c0_6 = arith.constant 0 : index
    %22 = vector.load %arg4[%c0_5, %c0_6] : memref<32x64xf32, #tpu.memory_space<vmem>>, vector<32x64xf32>
    %cst_7 = arith.constant dense<0.000000e+00> : vector<8x64xf32>
    %23 = tpu.matmul %21, %22, %cst_7 {dimension_numbers = #tpu.dot_dimension_numbers<[1], [0], [0], [1], [0, 0, 1, 1], [], []>} : vector<8x32xf32>, vector<32x64xf32>, vector<8x64xf32> -> vector<8x64xf32>
    %c0_8 = arith.constant 0 : index
    %c0_9 = arith.constant 0 : index
    %24 = vector.load %arg5[%c0_8, %c0_9] : memref<1x64xf32, #tpu.memory_space<vmem>>, vector<1x64xf32>
    %25 = vector.broadcast %24 : vector<1x64xf32> to vector<8x64xf32>
    %26 = arith.addf %23, %25 : vector<8x64xf32>
    %27 = math.tanh %26 : vector<8x64xf32>
    %c0_10 = arith.constant 0 : index
    %c0_11 = arith.constant 0 : index
    %28 = vector.load %arg6[%c0_10, %c0_11] : memref<64x32xf32, #tpu.memory_space<vmem>>, vector<64x32xf32>
    %cst_12 = arith.constant dense<0.000000e+00> : vector<8x32xf32>
    %29 = tpu.matmul %27, %28, %cst_12 {dimension_numbers = #tpu.dot_dimension_numbers<[1], [0], [0], [1], [0, 0, 1, 1], [], []>} : vector<8x64xf32>, vector<64x32xf32>, vector<8x32xf32> -> vector<8x32xf32>
    %c0_13 = arith.constant 0 : index
    %c0_14 = arith.constant 0 : index
    %30 = vector.load %arg7[%c0_13, %c0_14] : memref<1x32xf32, #tpu.memory_space<vmem>>, vector<1x32xf32>
    %31 = vector.broadcast %30 : vector<1x32xf32> to vector<8x32xf32>
    %32 = arith.addf %29, %31 : vector<8x32xf32>
    %33 = arith.addf %32, %21 : vector<8x32xf32>
    %c0_15 = arith.constant 0 : index
    %c0_16 = arith.constant 0 : index
    %34 = vector.load %arg8[%c0_15, %c0_16] : memref<32x8xf32, #tpu.memory_space<vmem>>, vector<32x8xf32>
    %cst_17 = arith.constant dense<0.000000e+00> : vector<8x8xf32>
    %35 = tpu.matmul %33, %34, %cst_17 {dimension_numbers = #tpu.dot_dimension_numbers<[1], [0], [0], [1], [0, 0, 1, 1], [], []>} : vector<8x32xf32>, vector<32x8xf32>, vector<8x8xf32> -> vector<8x8xf32>
    %c0_18 = arith.constant 0 : index
    %c0_19 = arith.constant 0 : index
    %36 = vector.load %arg9[%c0_18, %c0_19] : memref<1x8xf32, #tpu.memory_space<vmem>>, vector<1x8xf32>
    %37 = vector.broadcast %36 : vector<1x8xf32> to vector<8x8xf32>
    %38 = arith.addf %35, %37 : vector<8x8xf32>
    %c0_20 = arith.constant 0 : index
    %c0_21 = arith.constant 0 : index
    %39 = vector.load %arg10[%c0_20, %c0_21] : memref<8x8xf32, #tpu.memory_space<vmem>>, vector<8x8xf32>
    tpu.vector_store %arg10[%c0_20, %c0_21], %38 {strides = array<i32>} : memref<8x8xf32, #tpu.memory_space<vmem>>, vector<8x8xf32>,
    return
  }
  func.func @transform_0(%arg0: i32) -> (i32, i32) {
    %c0_i32 = arith.constant 0 : i32
    %c0_i32_0 = arith.constant 0 : i32
    return %arg0, %c0_i32 : i32, i32
  }
  func.func @transform_1(%arg0: i32) -> (i32, i32) {
    %c0_i32 = arith.constant 0 : i32
    %c0_i32_0 = arith.constant 0 : i32
    %c0_i32_1 = arith.constant 0 : i32
    return %c0_i32, %c0_i32_0 : i32, i32
  }
  func.func @transform_2(%arg0: i32) -> (i32, i32) {
    %c0_i32 = arith.constant 0 : i32
    %c0_i32_0 = arith.constant 0 : i32
    %c0_i32_1 = arith.constant 0 : i32
    return %c0_i32, %c0_i32_0 : i32, i32
  }
  func.func @transform_3(%arg0: i32) -> (i32, i32) {
    %c0_i32 = arith.constant 0 : i32
    %c0_i32_0 = arith.constant 0 : i32
    %c0_i32_1 = arith.constant 0 : i32
    return %c0_i32, %c0_i32_0 : i32, i32
  }
  func.func @transform_4(%arg0: i32) -> (i32, i32) {
    %c0_i32 = arith.constant 0 : i32
    %c0_i32_0 = arith.constant 0 : i32
    %c0_i32_1 = arith.constant 0 : i32
    return %c0_i32, %c0_i32_0 : i32, i32
  }
  func.func @transform_5(%arg0: i32) -> (i32, i32) {
    %c0_i32 = arith.constant 0 : i32
    %c0_i32_0 = arith.constant 0 : i32
    %c0_i32_1 = arith.constant 0 : i32
    return %c0_i32, %c0_i32_0 : i32, i32
  }
  func.func @transform_6(%arg0: i32) -> (i32, i32) {
    %c0_i32 = arith.constant 0 : i32
    %c0_i32_0 = arith.constant 0 : i32
    %c0_i32_1 = arith.constant 0 : i32
    return %c0_i32, %c0_i32_0 : i32, i32
  }
  func.func @transform_7(%arg0: i32) -> (i32, i32) {
    %c0_i32 = arith.constant 0 : i32
    %c0_i32_0 = arith.constant 0 : i32
    %c0_i32_1 = arith.constant 0 : i32
    return %c0_i32, %c0_i32_0 : i32, i32
  }
  func.func @transform_8(%arg0: i32) -> (i32, i32) {
    %c0_i32 = arith.constant 0 : i32
    %c0_i32_0 = arith.constant 0 : i32
    %c0_i32_1 = arith.constant 0 : i32
    return %c0_i32, %c0_i32_0 : i32, i32
  }
  func.func @transform_9(%arg0: i32) -> (i32, i32) {
    %c0_i32 = arith.constant 0 : i32
    %c0_i32_0 = arith.constant 0 : i32
    return %arg0, %c0_i32 : i32, i32
  }
}

</mosaic_0001>

<bundles_post_ra>
// kernel: dptb_forward.2
= control target key start
LH: loop header
LB: loop body
LE: loop exit
PB: predicated region body
PF: predicated region fallthrough
CT: control target
= control target key end

     0   :  { %s826_s30 = smov 0   ;;  %s937_s0 = inlined_call_operand.vmem [shape: s32[16,1], index: 0, kind: input, shape index: {}]   ;;  %s938_s1 = inlined_call_operand.vmem [shape: f32[2,32], index: 1, kind: input, shape index: {}]   ;;  %s939_s2 = inlined_call_operand.vmem [shape: f32[1,32], index: 2, kind: input, shape index: {}]   ;;  %s940_s3 = inlined_call_operand.vmem [shape: f32[32,64], index: 3, kind: input, shape index: {}]   ;;  %s941_s4 = inlined_call_operand.vmem [shape: f32[1,64], index: 4, kind: input, shape index: {}]   ;;  %s942_s5 = inlined_call_operand.vmem [shape: f32[64,32], index: 5, kind: input, shape index: {}]   ;;  %s943_s6 = inlined_call_operand.vmem [shape: f32[1,32], index: 6, kind: input, shape index: {}]   ;;  %s944_s7 = inlined_call_operand.vmem [shape: f32[32,8], index: 7, kind: input, shape index: {}]   ;;  %s945_s8 = inlined_call_operand.vmem [shape: f32[1,8], index: 8, kind: input, shape index: {}]   ;;  %s946_s9 = inlined_call_operand.vmem [shape: f32[16,8], index: 9, kind: output, shape index: {}]  }
   0x1 LB: > { %s675_s10 = sadd.s32 4294967295, %s771_s30   ;;  %p679_p0 = scmp.ge.s32.totalorder %s771_s30, 1  ;;  %s771_s30 = sphi %s826_s30, %s19_s30  }
   0x2   : > { %p286_p1 = scmp.lt.s32.totalorder %s771_s30, 3 }
   0x4   : > { %p287_p2 = pnand %p679_p0, %p286_p1 }
   0x5   : > { %p320_p3 = scmp.lt.s32.totalorder (!%p287_p2), %s675_s10, 1 }
   0x6   : > { %290 = sbr.rel (%p287_p2) target bundleno = 751 (0x2ef), region = 56 }
   0xb   : > { %v773_v0 = vmov 0   ;;  %s948_s10 = smov (!%p320_p3, %s675_s10), 1  ;;  %v774_v1 = vmov 0.0   ;;  %v363_v2 = vld [vmem:[%s940_s3 + $0x18] sm:$0xff]  ;;  %v362_v4 = vld [vmem:[%s940_s3 + $0x10] sm:$0xff]  ;;  %v361_v6 = vld [vmem:[%s940_s3 + $0x8] sm:$0xff]  ;;  %v336_v9 = vlaneseq }
   0xc   : > { %762 = vset.pattern.permute.xlu0 %v773_v0  ;;  %s680_s11 = sshll.u32 %s948_s10, 3  ;;  %710 = vmatprep.subr.mxu0 %v774_v1  ;;  %v360_v8 = vld [vmem:[%s940_s3] sm:$0xff]  ;;  %vm775_vm2 = vmmov 0   ;;  %vm371_vm5 = vcmask 261120   ;;  %v453_v22 = vld [vmem:[%s942_s5 + $0x38] sm:$0xff]  ;;  %v452_v23 = vld [vmem:[%s942_s5 + $0x30] sm:$0xff] }
   0xd   : > { %s323_s14 = scalar_lea.vmem %s937_s0, %s680_s11  ;;  %721 = vmatprep.subr.mxu1 %v774_v1  ;;  %711 = vmatpush3.msra.mxu0 %v363_v2  ;;  %v337_v10 = vshrl.u32 %v336_v9, 7  ;;  %v329_v12 = vld [vmem:[%s938_s1] sm:$0x3]  ;;  %v451_v24 = vld [vmem:[%s942_s5 + $0x28] sm:$0xff]  ;;  %v449_v26 = vld [vmem:[%s942_s5 + $0x18] sm:$0xff]  ;;  %vm461_vm6 = vcmask 523264   ;;  %s327_s23 = scalar_lea.vmem %s946_s9, %s680_s11 }
   0xe   : > { %v328_v3 = vld [vmem:[%s323_s14] sm:$0xff]  ;;  %712 = vmatprep.subr.mxu0 %v774_v1  ;;  %718 = vmatprep.mubr.msk.f32.mxu0 %vm775_vm2, %v774_v1  ;;  %v448_v27 = vld [vmem:[%s942_s5 + $0x10] sm:$0xff]  ;;  %v447_v28 = vld [vmem:[%s942_s5 + $0x8] sm:$0xff]  ;;  %vm620_vm7 = vcmask 64512  }
   0xf   : > { %vm330_vm0 = vcmp.eq.s32.totalorder %v328_v3, 0  ;;  %vm341_vm1 = vcmp.eq.s32.totalorder %v328_v3, 1  ;;  %713 = vmatpush3.msra.mxu0 %v362_v4  ;;  %737 = vmatprep.mubr.msk.f32.mxu1 %vm775_vm2, %v774_v1  ;;  %v338_v11 = vsub.s32 0, %v337_v10  ;;  %v349_v13 = vsub.s32 1, %v337_v10  ;;  %v682_v17 = vld [vmem:[%s939_s2] ss:$0 sm:$0xff] }
  0x10   : > { %v331_v5 = vsel %vm330_vm0, 1, %v773_v0  ;;  %714 = vmatprep.subr.mxu0 %v774_v1  ;;  %v342_v7 = vsel %vm341_vm1, 1, %v773_v0  ;;  %722 = vmatpush3.msra.mxu1 %v453_v22  ;;  %v450_v25 = vld [vmem:[%s942_s5 + $0x20] sm:$0xff]  ;;  %v539_v30 = vld [vmem:[%s944_s7 + $0x18] sm:$0xff]  ;;  %v538_v36 = vld [vmem:[%s944_s7 + $0x10] sm:$0xff] }
  0x11   : > { %333 = vperm.xlu0 %762, %v331_v5   ;;  %715 = vmatpush3.msra.mxu0 %v361_v6  ;;  %v339_v15 = vrot.slane %v329_v12, %v338_v11  ;;  %v350_v16 = vrot.slane %v329_v12, %v349_v13  ;;  %v446_v29 = vld [vmem:[%s942_s5] sm:$0xff]  ;;  %v537_v37 = vld [vmem:[%s944_s7 + $0x8] sm:$0xff] }
  0x12   : > { %716 = vmatprep.subr.mxu0 %v774_v1  ;;  %723 = vmatprep.subr.mxu1 %v774_v1  ;;  %v683_v31 = vld [vmem:[%s941_s4] ss:$0 sm:$0xff] }
  0x13   : > { %717 = vmatpush3.msra.mxu0 %v360_v8  ;;  %724 = vmatpush3.msra.mxu1 %v452_v23  ;;  %v536_v38 = vld [vmem:[%s944_s7] sm:$0xff] }
  0x14   : > { %740 = vmatprep.subr.mxu0 %v774_v1  ;;  %725 = vmatprep.subr.mxu1 %v774_v1  ;;  %v685_v39 = vld [vmem:[%s943_s6] ss:$0 sm:$0xff] }
  0x15   : > { %344 = vperm.xlu0 %762, %v342_v7   ;;  %726 = vmatpush3.msra.mxu1 %v451_v24  ;;  %v687_v44 = vld [vmem:[%s945_s8] ss:$0 sm:$0xff] }
  0x16   : > { %727 = vmatprep.subr.mxu1 %v774_v1 }
  0x17   : > { %728 = vmatpush3.msra.mxu1 %v450_v25 }
  0x18   : > { %729 = vmatprep.subr.mxu1 %v774_v1 }
  0x19   : > { %730 = vmatpush3.msra.mxu1 %v449_v26 }
  0x1a   : > { %731 = vmatprep.subr.mxu1 %v774_v1 }
  0x1b   : > { %732 = vmatpush3.msra.mxu1 %v448_v27 }
  0x1c   : > { %733 = vmatprep.subr.mxu1 %v774_v1 }
  0x1d   : > { %734 = vmatpush3.msra.mxu1 %v447_v28 }
  0x1e   : > { %735 = vmatprep.subr.mxu1 %v774_v1 }
  0x1f   : > { %736 = vmatpush3.msra.mxu1 %v446_v29 }
  0x8c   : > { %v334_v14 = vpop.permute.xlu0 %333 }
  0x8d   : > { %vm335_vm3 = vcmp.eq.s32.totalorder %v334_v14, 1 }
  0x8e   : > { %v340_v19 = vsel %vm335_vm3, %v339_v15, 0.0 }
  0x90   : > { %v345_v18 = vpop.permute.xlu0 %344 }
  0x91   : > { %vm346_vm4 = vcmp.eq.s32.totalorder %v345_v18, 1 }
  0x92   : > { %v351_v20 = vsel %vm346_vm4, %v350_v16, %v340_v19 }
  0x93   : > { %v359_v21 = vadd.f32 %v682_v17, %v351_v20 }
  0x95   : > { %719 = vmatmul.mubr.msk.f32.vlgmr.msra.gmra.mxu0 %vm371_vm5, %v359_v21 }
  0x96   : > { %748 = vmatprep.mubr.msk.f32.mxu0 %vm775_vm2, %v774_v1  ;;  %741 = vmatpush3.msra.mxu0 %v539_v30 }
  0x97   : > { %742 = vmatprep.subr.mxu0 %v774_v1 }
  0x98   : > { %743 = vmatpush3.msra.mxu0 %v538_v36 }
  0x99   : > { %744 = vmatprep.subr.mxu0 %v774_v1 }
  0x9a   : > { %745 = vmatpush3.msra.mxu0 %v537_v37 }
  0x9b   : > { %746 = vmatprep.subr.mxu0 %v774_v1 }
  0x9c   : > { %747 = vmatpush3.msra.mxu0 %v536_v38 }
 0x155   : > { %v441_v32 = vpop.f32.mrf.mxu0 }
 0x156   : > { %v442_v33 = vadd.f32 %v683_v31, %v441_v32 }
 0x157   : > { %v720_v34 = vpop.f32.mrf.mxu0 }
 0x158   : > { %763 = vtanh.f32 %v442_v33 }
 0x165   : > { %v764_v35 = vpop.eup %763 }
 0x166   : > { %738 = vmatmul.mubr.msk.f32.vlgmr.msra.gmra.mxu1 %vm461_vm6, %v764_v35 }
 0x226   : > { %v531_v40 = vpop.f32.mrf.mxu1 }
 0x227   : > { %v532_v41 = vadd.f32 %v685_v39, %v531_v40 }
 0x228   : > { %v739_v42 = vpop.f32.mrf.mxu1 }
 0x229   : > { %v535_v43 = vadd.f32 %v532_v41, %v359_v21 }
 0x22b   : > { %749 = vmatmul.mubr.msk.f32.vlgmr.msra.gmra.mxu0 %vm371_vm5, %v535_v43 }
 0x2eb   : > { %v616_v45 = vpop.f32.mrf.mxu0 }
 0x2ec   : > { %v617_v46 = vadd.f32 %v687_v44, %v616_v45 }
 0x2ed   : > { %v750_v47 = vpop.f32.mrf.mxu0 }
 0x2ee   : > { %621 = vst.msk [vmem:[%s327_s23] sm:$0xff] %vm620_vm7, %v617_v46 }
 0x2ef PF: > { %s19_s30 = sadd.s32 1, %s771_s30  }
 0x2f0   : > { %p16_p4 = scmp.ge.s32.totalorder %s19_s30, 4  }
 0x2f2   :  { %18 = sbr.rel (!%p16_p4) target bundleno = 1 (0x1), region = 86 }

// kernel: dptb_forward.3
= control target key start
LH: loop header
LB: loop body
LE: loop exit
PB: predicated region body
PF: predicated region fallthrough
CT: control target
= control target key end

     0   :  { %s1015_s13 = smov 0   ;;  %s1120_s0 = inlined_call_operand.vmem [shape: f32[32,1], index: 0, kind: input, shape index: {}]   ;;  %s1121_s1 = inlined_call_operand.vmem [shape: f32[1,32], index: 1, kind: input, shape index: {}]   ;;  %s1122_s2 = inlined_call_operand.vmem [shape: f32[32,32], index: 2, kind: input, shape index: {}]   ;;  %s1123_s3 = inlined_call_operand.vmem [shape: f32[1,32], index: 3, kind: input, shape index: {}]   ;;  %s1124_s4 = inlined_call_operand.vmem [shape: f32[32,64], index: 4, kind: input, shape index: {}]   ;;  %s1125_s5 = inlined_call_operand.vmem [shape: f32[1,64], index: 5, kind: input, shape index: {}]   ;;  %s1126_s6 = inlined_call_operand.vmem [shape: f32[64,32], index: 6, kind: input, shape index: {}]   ;;  %s1127_s7 = inlined_call_operand.vmem [shape: f32[1,32], index: 7, kind: input, shape index: {}]   ;;  %s1128_s8 = inlined_call_operand.vmem [shape: f32[32,16], index: 8, kind: input, shape index: {}]   ;;  %s1129_s9 = inlined_call_operand.vmem [shape: f32[1,16], index: 9, kind: input, shape index: {}]   ;;  %s1130_s10 = inlined_call_operand.vmem [shape: f32[32,16], index: 10, kind: output, shape index: {}]  }
   0x1 LB: > { %s829_s14 = sadd.s32 4294967295, %s957_s13   ;;  %p833_p0 = scmp.ge.s32.totalorder %s957_s13, 1  ;;  %s957_s13 = sphi %s1015_s13, %s20_s13  }
   0x2   : > { %p313_p1 = scmp.lt.s32.totalorder %s957_s13, 3 }
   0x4   : > { %p314_p2 = pnand %p833_p0, %p313_p1 }
   0x5   : > { %s834_s15 = sshll.u32 (!%p314_p2), %s829_s14, 1 }
   0x6   : > { %317 = sbr.rel (%p314_p2) target bundleno = 973 (0x3cd), region = 60  ;;  %p352_p3 = scmp.lt.s32.totalorder (!%p314_p2), %s834_s15, 3 }
   0xb   : > { %v959_v0 = vmov 0   ;;  %s1132_s15 = smov (!%p352_p3, %s834_s15), 3  ;;  %v395_v3 = vld [vmem:[%s1122_s2 + $0x18] sm:$0xff]  ;;  %v394_v4 = vld [vmem:[%s1122_s2 + $0x10] sm:$0xff]  ;;  %v393_v5 = vld [vmem:[%s1122_s2 + $0x8] sm:$0xff]  ;;  %vm403_vm0 = vcmask 261120  }
   0xc   : > { %942 = vset.pattern.permute.xlu0 %v959_v0  ;;  %s835_s16 = sshll.u32 %s1132_s15, 3  ;;  %881 = vmatprep.subr.mxu0 %v395_v3  ;;  %v392_v6 = vld [vmem:[%s1122_s2] sm:$0xff]  ;;  %v488_v7 = vld [vmem:[%s1124_s4 + $0x18] sm:$0xff]  ;;  %v487_v21 = vld [vmem:[%s1124_s4 + $0x10] sm:$0xff]  ;;  %vm594_vm1 = vcmask 523264   ;;  %vm770_vm2 = vcmask 130048  }
   0xd   : > { %s355_s19 = scalar_lea.vmem %s1120_s0, %s835_s16  ;;  %882 = vmatpush3.msra.mxu0 %v395_v3  ;;  %892 = vmatprep.subr.mxu1 %v488_v7  ;;  %v838_v8 = vld [vmem:[%s1121_s1] ss:$0 sm:$0xff]  ;;  %v486_v22 = vld [vmem:[%s1124_s4 + $0x8] sm:$0xff]  ;;  %v586_v29 = vld [vmem:[%s1126_s6 + $0x38] sm:$0xff]  ;;  %s361_s21 = scalar_lea.vmem %s1130_s10, %s835_s16 }
   0xe   : > { %v363_v1 = vld [vmem:[%s355_s19] sm:$0xff]  ;;  %v364_v2 = vld [vmem:[%s355_s19 + $0x8] sm:$0xff]  ;;  %883 = vmatprep.subr.mxu0 %v394_v4  ;;  %893 = vmatpush3.msra.mxu1 %v488_v7  ;;  %v585_v30 = vld [vmem:[%s1126_s6 + $0x30] sm:$0xff] }
   0xf   : > { %368 = vperm.xlu0 %942, %v363_v1   ;;  %884 = vmatpush3.msra.mxu0 %v394_v4  ;;  %v485_v23 = vld [vmem:[%s1124_s4] sm:$0xff]  ;;  %v584_v31 = vld [vmem:[%s1126_s6 + $0x28] sm:$0xff]  ;;  %v582_v33 = vld [vmem:[%s1126_s6 + $0x18] sm:$0xff] }
  0x10   : > { %885 = vmatprep.subr.mxu0 %v393_v5  ;;  %894 = vmatprep.subr.mxu1 %v487_v21  ;;  %v839_v25 = vld [vmem:[%s1123_s3] ss:$0 sm:$0xff]  ;;  %v581_v34 = vld [vmem:[%s1126_s6 + $0x10] sm:$0xff]  ;;  %v580_v35 = vld [vmem:[%s1126_s6 + $0x8] sm:$0xff] }
  0x11   : > { %886 = vmatpush3.msra.mxu0 %v393_v5  ;;  %895 = vmatpush3.msra.mxu1 %v487_v21  ;;  %v583_v32 = vld [vmem:[%s1126_s6 + $0x20] sm:$0xff]  ;;  %v681_v44 = vld [vmem:[%s1128_s8 + $0x18] sm:$0xff]  ;;  %v680_v45 = vld [vmem:[%s1128_s8 + $0x10] sm:$0xff] }
  0x12   : > { %887 = vmatprep.subr.mxu0 %v392_v6  ;;  %896 = vmatprep.subr.mxu1 %v486_v22  ;;  %v579_v36 = vld [vmem:[%s1126_s6] sm:$0xff]  ;;  %v679_v46 = vld [vmem:[%s1128_s8 + $0x8] sm:$0xff] }
  0x13   : > { %373 = vperm.xlu0 %942, %v364_v2   ;;  %888 = vmatpush3.msra.mxu0 %v392_v6  ;;  %v842_v37 = vld [vmem:[%s1125_s5] ss:$0 sm:$0xff] }
  0x14   : > { %897 = vmatpush3.msra.mxu1 %v486_v22  ;;  %903 = vmatprep.subr.mxu0 %v586_v29  ;;  %v678_v47 = vld [vmem:[%s1128_s8] sm:$0xff] }
  0x15   : > { %898 = vmatprep.subr.mxu1 %v485_v23  ;;  %v845_v48 = vld [vmem:[%s1127_s7] ss:$0 sm:$0xff] }
  0x16   : > { %899 = vmatpush3.msra.mxu1 %v485_v23  ;;  %v848_v56 = vld [vmem:[%s1129_s9] ss:$0 sm:$0xff] }
  0x17   : > { %922 = vmatprep.subr.mxu1 %v681_v44 }
  0x8a   : > { %v369_v9 = vpop.permute.xlu0 %368 }
  0x8b   : > { %v382_v10 = vsub.f32 %v369_v9, %v838_v8 }
  0x8d   : > { %v384_v11 = vmul.f32 %v382_v10, %v382_v10 }
  0x8e   : > { %v374_v12 = vpop.permute.xlu0 %373 }
  0x8f   : > { %v386_v13 = vmul.f32 -4.0, %v384_v11  ;;  %v383_v14 = vsub.f32 %v374_v12, %v838_v8 }
  0x91   : > { %v388_v15 = vmul.f32 1.442695, %v386_v13  ;;  %v385_v16 = vmul.f32 %v383_v14, %v383_v14 }
  0x93   : > { %943 = vpow2.f32 %v388_v15  ;;  %v387_v17 = vmul.f32 -4.0, %v385_v16 }
  0x95   : > { %v390_v18 = vmul.f32 1.442695, %v387_v17 }
  0x97   : > { %945 = vpow2.f32 %v390_v18 }
  0xa0   : > { %v944_v19 = vpop.eup %943 }
  0xa1   : > { %889 = vmatprep.mubr.msk.f32.mxu0 %vm403_vm0, %v944_v19 }
  0xa4   : > { %v946_v20 = vpop.eup %945 }
  0xa5   : > { %890 = vmatmul.mubr.msk.f32.vlgmr.msra.gmra.mxu0 %vm403_vm0, %v946_v20 }
  0xa6   : > { %904 = vmatpush3.msra.mxu0 %v586_v29 }
  0xa7   : > { %905 = vmatprep.subr.mxu0 %v585_v30 }
  0xa8   : > { %906 = vmatpush3.msra.mxu0 %v585_v30 }
  0xa9   : > { %907 = vmatprep.subr.mxu0 %v584_v31 }
  0xaa   : > { %908 = vmatpush3.msra.mxu0 %v584_v31 }
  0xab   : > { %909 = vmatprep.subr.mxu0 %v583_v32 }
  0xac   : > { %910 = vmatpush3.msra.mxu0 %v583_v32 }
  0xad   : > { %911 = vmatprep.subr.mxu0 %v582_v33 }
  0xae   : > { %912 = vmatpush3.msra.mxu0 %v582_v33 }
  0xaf   : > { %913 = vmatprep.subr.mxu0 %v581_v34 }
  0xb0   : > { %914 = vmatpush3.msra.mxu0 %v581_v34 }
  0xb1   : > { %915 = vmatprep.subr.mxu0 %v580_v35 }
  0xb2   : > { %916 = vmatpush3.msra.mxu0 %v580_v35 }
  0xb3   : > { %917 = vmatprep.subr.mxu0 %v579_v36 }
  0xb4   : > { %918 = vmatpush3.msra.mxu0 %v579_v36 }
 0x165   : > { %v891_v24 = vpop.f32.mrf.mxu0 }
 0x166   : > { %v482_v28 = vadd.f32 %v891_v24, %v839_v25 }
 0x167   : > { %v476_v26 = vpop.f32.mrf.mxu0 }
 0x168   : > { %v477_v27 = vadd.f32 %v839_v25, %v476_v26 }
 0x16a   : > { %900 = vmatprep.mubr.msk.f32.mxu1 %vm403_vm0, %v477_v27 }
 0x16b   : > { %901 = vmatmul.mubr.msk.f32.vlgmr.msra.gmra.mxu1 %vm403_vm0, %v482_v28 }
 0x16c   : > { %923 = vmatpush3.msra.mxu1 %v681_v44 }
 0x16d   : > { %924 = vmatprep.subr.mxu1 %v680_v45 }
 0x16e   : > { %925 = vmatpush3.msra.mxu1 %v680_v45 }
 0x16f   : > { %926 = vmatprep.subr.mxu1 %v679_v46 }
 0x170   : > { %927 = vmatpush3.msra.mxu1 %v679_v46 }
 0x171   : > { %928 = vmatprep.subr.mxu1 %v678_v47 }
 0x172   : > { %929 = vmatpush3.msra.mxu1 %v678_v47 }
 0x22b   : > { %v902_v38 = vpop.f32.mrf.mxu1 }
 0x22c   : > { %v574_v39 = vadd.f32 %v902_v38, %v842_v37 }
 0x22d   : > { %v568_v40 = vpop.f32.mrf.mxu1 }
 0x22e   : > { %v569_v41 = vadd.f32 %v842_v37, %v568_v40 }
 0x230   : > { %947 = vtanh.f32 %v569_v41 }
 0x231   : > { %949 = vtanh.f32 %v574_v39 }
 0x23d   : > { %v948_v42 = vpop.eup %947 }
 0x23e   : > { %v950_v43 = vpop.eup %949  ;;  %919 = vmatprep.mubr.msk.f32.mxu0 %vm594_vm1, %v948_v42 }
 0x23f   : > { %920 = vmatmul.mubr.msk.f32.vlgmr.msra.gmra.mxu0 %vm594_vm1, %v950_v43 }
 0x2ff   : > { %v921_v49 = vpop.f32.mrf.mxu0 }
 0x300   : > { %v673_v50 = vadd.f32 %v921_v49, %v845_v48 }
 0x301   : > { %v667_v51 = vpop.f32.mrf.mxu0 }
 0x302   : > { %v668_v52 = vadd.f32 %v845_v48, %v667_v51  ;;  %v677_v54 = vadd.f32 %v673_v50, %v482_v28 }
 0x304   : > { %v676_v53 = vadd.f32 %v668_v52, %v477_v27 }
 0x306   : > { %930 = vmatprep.mubr.msk.f32.mxu1 %vm403_vm0, %v676_v53 }
 0x307   : > { %931 = vmatmul.mubr.msk.f32.vlgmr.msra.gmra.mxu1 %vm403_vm0, %v677_v54 }
 0x3c7   : > { %v932_v55 = vpop.f32.mrf.mxu1 }
 0x3c8   : > { %v767_v59 = vadd.f32 %v932_v55, %v848_v56 }
 0x3c9   : > { %v761_v57 = vpop.f32.mrf.mxu1 }
 0x3ca   : > { %v762_v58 = vadd.f32 %v848_v56, %v761_v57  ;;  %772 = vst.msk [vmem:[%s361_s21 + $0x8] sm:$0xff] %vm770_vm2, %v767_v59 }
 0x3cc   : > { %771 = vst.msk [vmem:[%s361_s21] sm:$0xff] %vm770_vm2, %v762_v58 }
 0x3cd PF: > { %s20_s13 = sadd.s32 1, %s957_s13  }
 0x3ce   : > { %p17_p4 = scmp.ge.s32.totalorder %s20_s13, 4  }
 0x3d0   :  { %19 = sbr.rel (!%p17_p4) target bundleno = 1 (0x1), region = 90 }

</bundles_post_ra>
